<compile_context>
chip_gen: v7x
topology: tpu7x:2x2x1
jax: 0.10.0
libtpu: 0.0.40
codegen_flags: <defaults>
</compile_context>

<pallas_src>
import functools

import jax
import jax.numpy as jnp
from jax.experimental import pallas as pl
from jax.experimental.pallas import tpu as pltpu

EMBEDDING_LENGTH = 300
HIDDEN_SIZE = 300
IN_LEN = 2 * HIDDEN_SIZE + EMBEDDING_LENGTH + 1   # h(600) + x(300) + bias slot(1) = 901
PACKED = 1024                                     # padded to 8 * 128 = one f32 vreg


def _round_up(n, m):
    return ((n + m - 1) // m) * m


# ----------------------------- kernels ------------------------------------

def policy_kernel(in_ref, w_ref, out_ref):
    # in_ref : (8, 128) f32  packed [h, x, 1.0, zeros]
    # w_ref  : (8, 128) f32  packed [W1, W2, b,  zeros]
    # out_ref: (1, 2)   f32  lane-major [1-s, s]
    s = jnp.sum(in_ref[...] * w_ref[...])                     # fused h@W1 + x@W2 + b
    s = jnp.clip(jax.nn.sigmoid(s), 1e-5, 1.0 - 1e-5)
    col = jax.lax.broadcasted_iota(jnp.int32, out_ref.shape, 1)
    out_ref[...] = jnp.where(col == 0, 1.0 - s, s)


def policy_kernel_batched(in_ref, w_ref, out_ref):
    # in_ref : (TB, 1024) f32  one packed decision per row
    # w_ref  : (1, 1024)  f32  packed params (broadcast over rows)
    # out_ref: (TB, 2)    f32  lane-major [1-s, s] per row
    s = jnp.sum(in_ref[...] * w_ref[...], axis=-1, keepdims=True)   # (TB, 1)
    s = jnp.clip(jax.nn.sigmoid(s), 1e-5, 1.0 - 1e-5)
    col = jax.lax.broadcasted_iota(jnp.int32, out_ref.shape, 1)
    out_ref[...] = jnp.where(col == 0, 1.0 - s, s)


# ------------------- one-time parameter packing (init) ---------------------

def pack_params(W1, W2, b):
    """Pack [W1; W2; b] into a single zero-padded (PACKED,) f32 buffer. Call ONCE."""
    w = jnp.concatenate(
        [W1.reshape(-1), W2.reshape(-1), b.reshape(-1)]
    ).astype(jnp.float32)                                     # (901,)
    return jnp.pad(w, (0, PACKED - IN_LEN))                   # (1024,)


# ----------------------------- wrappers ------------------------------------

@jax.jit
def policy_net_forward(h, x, packed_w):
    """Pallas equivalent of policyNet.forward(h, x). Returns (2, 1) float32.

    h: flattens to 2*HIDDEN_SIZE elements; x: flattens to EMBEDDING_LENGTH.
    packed_w: (PACKED,) buffer from pack_params (prepared once at init).
    """
    inp = jnp.concatenate(
        [h.reshape(-1).astype(jnp.float32),
         x.reshape(-1).astype(jnp.float32),
         jnp.ones((1,), jnp.float32)]                          # bias slot
    )
    inp = jnp.pad(inp, (0, PACKED - IN_LEN)).reshape(8, 128)

    vmem = pltpu.MemorySpace.VMEM
    out = pl.pallas_call(
        policy_kernel,
        out_shape=jax.ShapeDtypeStruct((1, 2), jnp.float32),
        in_specs=[pl.BlockSpec(memory_space=vmem),
                  pl.BlockSpec(memory_space=vmem)],
        out_specs=pl.BlockSpec(memory_space=vmem),
    )(inp, packed_w.reshape(8, 128))
    # PyTorch layout: cat([1-s, s], dim=0) -> (2, 1)
    return out.reshape(2, 1)


@functools.partial(jax.jit, static_argnames=("block_rows",))
def policy_net_forward_batched(hs, xs, packed_w, block_rows=256):
    """Batched policyNet over B decisions: hs (B, 2*hidden), xs (B, embed) -> (B, 2).

    Row i of the result is [1 - s_i, s_i].
    """
    B = hs.shape[0]
    hs = hs.reshape(B, -1).astype(jnp.float32)
    xs = xs.reshape(B, -1).astype(jnp.float32)
    inp = jnp.concatenate([hs, xs, jnp.ones((B, 1), jnp.float32)], axis=1)   # (B, 901)

    tb = min(block_rows, _round_up(B, 8))          # rows per block, multiple of 8
    Bp = _round_up(B, tb)
    inp = jnp.pad(inp, ((0, Bp - B), (0, PACKED - IN_LEN)))                  # (Bp, 1024)

    out = pl.pallas_call(
        policy_kernel_batched,
        out_shape=jax.ShapeDtypeStruct((Bp, 2), jnp.float32),
        grid_spec=pltpu.PrefetchScalarGridSpec(
            num_scalar_prefetch=0,
            grid=(Bp // tb,),
            in_specs=[pl.BlockSpec((tb, PACKED), lambda i: (i, 0)),
                      pl.BlockSpec((1, PACKED), lambda i: (0, 0))],
            out_specs=pl.BlockSpec((tb, 2), lambda i: (i, 0)),
        ),
        compiler_params=pltpu.CompilerParams(
            dimension_semantics=("parallel",)),     # shard batch across TCs on v7x
    )(inp, packed_w.reshape(1, PACKED))
    return out[:B]


# ------------------------------- demo --------------------------------------

if __name__ == "__main__":
    key = jax.random.PRNGKey(0)
    k_w1, k_w2, k_b, k_h, k_x, k_hb, k_xb = jax.random.split(key, 7)

    # Parameters, matching nn.Parameter(...).uniform_(-0.5, 0.5)
    W1 = jax.random.uniform(k_w1, (2 * HIDDEN_SIZE, 1), jnp.float32, -0.5, 0.5)
    W2 = jax.random.uniform(k_w2, (EMBEDDING_LENGTH, 1), jnp.float32, -0.5, 0.5)
    b = jax.random.uniform(k_b, (1, 1), jnp.float32, -0.5, 0.5)

    packed_w = pack_params(W1, W2, b)               # one-time packing (hoisted out of forward)

    # --- single sample (exact policyNet.forward semantics) ---
    h = jax.random.normal(k_h, (2, HIDDEN_SIZE), jnp.float32)       # flattens to 600
    x = jax.random.normal(k_x, (1, EMBEDDING_LENGTH), jnp.float32)  # flattens to 300
    out = jax.block_until_ready(policy_net_forward(h, x, packed_w))

    s_ref = jnp.clip(
        jax.nn.sigmoid(h.reshape(1, -1) @ W1 + x.reshape(1, -1) @ W2 + b),
        1e-5, 1.0 - 1e-5)
    ref = jnp.concatenate([1.0 - s_ref, s_ref], axis=0)             # (2, 1)
    assert out.shape == (2, 1), out.shape
    assert jnp.allclose(out, ref, rtol=1e-5, atol=1e-5), (out, ref)

    # --- batched over RL timesteps / environments ---
    B = 8
    hb = jax.random.normal(k_hb, (B, 2 * HIDDEN_SIZE), jnp.float32)
    xb = jax.random.normal(k_xb, (B, EMBEDDING_LENGTH), jnp.float32)
    outb = jax.block_until_ready(policy_net_forward_batched(hb, xb, packed_w))

    s_b = jnp.clip(jax.nn.sigmoid(hb @ W1 + xb @ W2 + b), 1e-5, 1.0 - 1e-5)  # (B, 1)
    ref_b = jnp.concatenate([1.0 - s_b, s_b], axis=1)                        # (B, 2)
    assert outb.shape == (B, 2), outb.shape
    assert jnp.allclose(outb, ref_b, rtol=1e-5, atol=1e-5), (outb, ref_b)

    print("KERNEL_OK")
</pallas_src>

<mosaic_0001>
module attributes {stable_mosaic.version = 11 : i64} {
  func.func @policy_kernel(%arg0: memref<8x128xf32, #tpu.memory_space<vmem>>, %arg1: memref<8x128xf32, #tpu.memory_space<vmem>>, %arg2: memref<1x2xf32, #tpu.memory_space<vmem>>) attributes {dimension_semantics = [], scalar_prefetch = 0 : i64, scratch_operands = 0 : i64, tpu.core_type = #tpu.core_type<tc>} {
    %c0 = arith.constant 0 : index
    %c0_0 = arith.constant 0 : index
    %0 = vector.load %arg0[%c0, %c0_0] : memref<8x128xf32, #tpu.memory_space<vmem>>, vector<8x128xf32>
    %c0_1 = arith.constant 0 : index
    %c0_2 = arith.constant 0 : index
    %1 = vector.load %arg1[%c0_1, %c0_2] : memref<8x128xf32, #tpu.memory_space<vmem>>, vector<8x128xf32>
    %2 = arith.mulf %0, %1 : vector<8x128xf32>
    %3 = vector.shape_cast %2 : vector<8x128xf32> to vector<1x8x128xf32>
    %cst = arith.constant dense<0.000000e+00> : vector<1xf32>
    %4 = vector.multi_reduction <add>, %3, %cst [1, 2] : vector<1x8x128xf32> to vector<1xf32>
    %5 = vector.shape_cast %4 : vector<1xf32> to vector<1x1x1xf32>
    %6 = vector.extract %5[0, 0, 0] : f32 from vector<1x1x1xf32>
    %7 = arith.negf %6 : f32
    %8 = math.exp %7 : f32
    %cst_3 = arith.constant 1.000000e+00 : f32
    %9 = arith.addf %cst_3, %8 : f32
    %10 = arith.divf %cst_3, %9 : f32
    %cst_4 = arith.constant 9.99999974E-6 : f32
    %cst_5 = arith.constant 0.999989986 : f32
    %11 = arith.maximumf %cst_4, %10 : f32
    %12 = arith.minimumf %cst_5, %11 : f32
    %13 = tpu.iota {dimensions = array<i32: 1>} : vector<1x2xi32>
    %c0_i32 = arith.constant 0 : i32
    %14 = vector.broadcast %c0_i32 : i32 to vector<1x2xi32>
    %15 = arith.cmpi eq, %13, %14 : vector<1x2xi32>
    %cst_6 = arith.constant 1.000000e+00 : f32
    %16 = arith.subf %cst_6, %12 : f32
    %17 = vector.broadcast %16 : f32 to vector<1x2xf32>
    %18 = vector.broadcast %12 : f32 to vector<1x2xf32>
    %19 = arith.select %15, %17, %18 : vector<1x2xi1>, vector<1x2xf32>
    %c0_7 = arith.constant 0 : index
    %c0_8 = arith.constant 0 : index
    %20 = vector.load %arg2[%c0_7, %c0_8] : memref<1x2xf32, #tpu.memory_space<vmem>>, vector<1x2xf32>
    tpu.vector_store %arg2[%c0_7, %c0_8], %19 {strides = array<i32>} : memref<1x2xf32, #tpu.memory_space<vmem>>, vector<1x2xf32>,
    return
  }
}

</mosaic_0001>

<bundles_post_ra>
// kernel: policy_net_forward.1
= control target key start
LH: loop header
LB: loop body
LE: loop exit
PB: predicated region body
PF: predicated region fallthrough
CT: control target
= control target key end

     0   :  { %s131_s0 = inlined_call_operand.vmem [shape: f32[8,128], index: 0, kind: input, shape index: {}]   ;;  %s132_s1 = inlined_call_operand.vmem [shape: f32[8,128], index: 1, kind: input, shape index: {}]   ;;  %s133_s2 = inlined_call_operand.hbm [shape: f32[1,2], index: 2, kind: output, shape index: {}]  }
   0x1   :  { %v12_v0 = vld [vmem:[%s131_s0] sm:$0xff] }
   0x2   :  { %v13_v1 = vld [vmem:[%s132_s1] sm:$0xff] }
   0x3   :  { %7 = vsyncpa [#allocation3], 0  ;;  %v14_v2 = vmul.f32 %v13_v1, %v12_v0  ;;  %v35_v15 = vlaneseq  ;;  %s95_s16 = smov 1e-05   ;;  %s96_s18 = smov 0.99999  }
   0x4   :  { %s97_s20 = smov [#allocation2]   ;;  %vm42_vm1 = vcmask 8192  }
   0x5   :  { %15 = vadd.xlane.f32.xlu0 %v14_v2  ;;  %v36_v16 = vand.u32 127, %v35_v15  ;;  %s50_s21 = sshll.u32 %s97_s20, 4  ;;  %s51_s21 = int_to_ptr.vmem [resolvable:$true] %s50_s21 }
   0x6   :  { %s71_s23 = scalar_lea.vmem %s51_s21, 16  ;;  %s75_s24 = scalar_lea.vmem %s51_s21, 32 }
   0x7   :  { %vm37_vm0 = vcmp.eq.s32.totalorder %v36_v16, 0  ;;  %p72_p0 = scmp.ne.s32.totalorder %s51_s21, %s71_s23  ;;  %p76_p1 = scmp.lt.s32.totalorder %s51_s21, %s51_s21 }
   0x8   :  { %p77_p2 = scmp.lt.s32.totalorder %s75_s24, %s71_s23 }
   0xa   :  { %p78_p3 = por %p77_p2, %p76_p1 }
   0xc   :  { %p79_p4 = pnand %p78_p3, %p72_p0 }
  0x92   :  { %v16_v3 = vpop.xlane.xlu0 %15 }
  0x93   :  { %v17_v4 = vrot.slane %v16_v3, 4 }
  0x95   :  { %v18_v5 = vadd.f32 %v17_v4, %v16_v3 }
  0x97   :  { %v19_v6 = vrot.slane %v18_v5, 2 }
  0x99   :  { %v20_v7 = vadd.f32 %v19_v6, %v18_v5 }
  0x9b   :  { %v21_v8 = vrot.slane %v20_v7, 1 }
  0x9d   :  { %v22_v9 = vadd.f32 %v21_v8, %v20_v7 }
  0x9f   :  { %58 = vpush %v22_v9 }
  0xd0   :  { %s59_s13 = spop %58 }
  0xd1   :  { %s24_s14 = sxor.u32 2147483648, %s59_s13 }
  0xd2   :  { %v25_v10 = vstv %s24_s14 }
  0xd3   :  { %v26_v11 = vmul.f32 1.442695, %v25_v10 }
  0xd5   :  { %67 = vpow2.f32 %v26_v11 }
  0xdf   :  { %v68_v12 = vpop.eup %67 }
  0xe0   :  { %60 = vpush %v68_v12 }
 0x111   :  { %s61_s0 = spop %60 }
 0x112   :  { %s29_s1 = sadd.f32 1.0, %s61_s0 }
 0x114   :  { %v30_v13 = vstv %s29_s1 }
 0x115   :  { %69 = vrcp.f32 %v30_v13 }
 0x11f   :  { %v70_v14 = vpop.eup %69 }
 0x120   :  { %62 = vpush %v70_v14 }
 0x151   :  { %s63_s15 = spop %62 }
 0x152   :  { %s33_s17 = smax.f32 %s95_s16, %s63_s15 }
 0x153   :  { %s34_s19 = smin.f32 %s96_s18, %s33_s17 }
 0x154   :  { %s38_s22 = ssub.f32 1.0, %s34_s19  ;;  %v40_v18 = vstv %s34_s19 }
 0x156   :  { %v39_v17 = vstv %s38_s22 }
 0x157   :  { %v41_v19 = vsel %vm37_vm0, %v39_v17, %v40_v18 }
 0x158   :  { %43 = vst.msk [vmem:[#allocation2] sm:$0x1] %vm42_vm1, %v41_v19 }
 0x159   :  { %82 = shalt.err (!%p79_p4)
}
 0x15a   :  { %s83_s27 = scalar_lea.hbm %s133_s2, 16 }
 0x15b   :  { %p84_p5 = scmp.ne.s32.totalorder %s133_s2, %s83_s27  ;;  %p87_p6 = scmp.lt.u32.totalorder %s83_s27, %s133_s2 }
 0x15d   :  { %p89_p7 = pnand %p87_p6, %p84_p5 }
 0x15f   :  { %92 = shalt.err (!%p89_p7)
}
 0x160   :  { %53 = dma.vmem_to_hbm [thread:$0]  %s51_s21, 16, %s133_s2, [#allocation3]  }
 0x161   :  { %93 = dma.done.wait [#allocation3], 16  }
 0x162   :  { %94 = vsyncadd [#allocation3], 4294967280 }
 0x163   :  { %57 = vsyncpa [#allocation3], 1 }

</bundles_post_ra>
